<compile_context>
chip_gen: v7x
topology: tpu7x:2x2x1
jax: 0.10.0
libtpu: 0.0.40
codegen_flags: <defaults>
</compile_context>

<pallas_src>
import functools

import jax
import jax.numpy as jnp
import numpy as np
from jax import lax
from jax.experimental import pallas as pl
from jax.experimental.pallas import tpu as pltpu


def _round_up(n, m):
    return ((n + m - 1) // m) * m


# ---------------------------------------------------------------------------
# Fast path (B << D): fused centering + Gram accumulation over a 1-D grid on D.
# ---------------------------------------------------------------------------
def _coral_gram_kernel(x_ref, y_ref, out_ref, gxx, gxy, gyy, *, scale):
    """Accumulate Gxx, Gxy, Gyy over D blocks; finalize the loss on last step.

    x_ref / y_ref : (B, TK) column block of the raw (uncentered) features.
    out_ref       : (8, 128) f32, scalar loss broadcast (written on last step).
    gxx/gxy/gyy   : (B, B) f32 VMEM scratch accumulators.
    """
    k = pl.program_id(0)
    nk = pl.num_programs(0)

    @pl.when(k == 0)
    def _init():
        gxx[...] = jnp.zeros_like(gxx)
        gxy[...] = jnp.zeros_like(gxy)
        gyy[...] = jnp.zeros_like(gyy)
        out_ref[...] = jnp.zeros_like(out_ref)

    xk = x_ref[...].astype(jnp.float32)                       # (B, TK)
    yk = y_ref[...].astype(jnp.float32)                       # (B, TK)
    # Center in-kernel: every block holds the full batch, so the per-column
    # mean is exact.  Zero-padded columns stay zero -> contribute nothing.
    xc = xk - jnp.mean(xk, axis=0, keepdims=True)
    yc = yk - jnp.mean(yk, axis=0, keepdims=True)

    dims = (((1,), (1,)), ((), ()))                           # contract over D
    gxx[...] += lax.dot_general(xc, xc, dims, preferred_element_type=jnp.float32)
    gxy[...] += lax.dot_general(xc, yc, dims, preferred_element_type=jnp.float32)
    gyy[...] += lax.dot_general(yc, yc, dims, preferred_element_type=jnp.float32)

    @pl.when(k == nk - 1)
    def _finalize():
        fro2 = (jnp.sum(gxx[...] * gxx[...])
                - 2.0 * jnp.sum(gxy[...] * gxy[...])
                + jnp.sum(gyy[...] * gyy[...]))
        out_ref[...] = jnp.zeros_like(out_ref) + fro2 * scale


def _coral_loss_gram(xf, yf, d_orig, b, *, block_k):
    _, d_pad = xf.shape
    nk = d_pad // block_k
    scale = 1.0 / (float(b - 1) ** 2 * 4.0 * float(d_orig) ** 2)
    kernel = functools.partial(_coral_gram_kernel, scale=scale)
    out = pl.pallas_call(
        kernel,
        out_shape=jax.ShapeDtypeStruct((8, 128), jnp.float32),
        grid=(nk,),
        in_specs=[pl.BlockSpec((b, block_k), lambda k: (0, k)),
                  pl.BlockSpec((b, block_k), lambda k: (0, k))],
        out_specs=pl.BlockSpec((8, 128), lambda k: (0, 0)),
        scratch_shapes=[pltpu.VMEM((b, b), jnp.float32),
                        pltpu.VMEM((b, b), jnp.float32),
                        pltpu.VMEM((b, b), jnp.float32)],
        compiler_params=pltpu.CompilerParams(
            dimension_semantics=("arbitrary",)),   # reduction over D blocks
    )(xf, yf)
    return out[0, 0]


# ---------------------------------------------------------------------------
# Generic path: tiled (D x D) covariance-difference blocks, upper triangle only.
# ---------------------------------------------------------------------------
def _coral_tiled_kernel(ii_ref, jj_ref, z_ref, zs_ref, out_ref, *,
                        scale, row_chunk):
    """One upper-triangular block pair (i, j) of M = Xc^T Xc - Yc^T Yc.

    ii_ref / jj_ref : (num_pairs,) int32 SMEM block-index tables (prefetch).
    z_ref  : (2B, TD) column block i of  z = [Xc;  Yc]
    zs_ref : (2B, TD) column block j of zs = [Xc; -Yc]
    out_ref: (1, 8, 128) f32 per-pair partial-loss slot (scalar broadcast).
    """
    p = pl.program_id(0)
    i = ii_ref[p]
    j = jj_ref[p]
    # Off-diagonal blocks appear twice in the full symmetric matrix.
    w = jnp.where(i == j, 1.0, 2.0).astype(jnp.float32)

    zi = z_ref[...]          # (2B, TD)
    zsj = zs_ref[...]        # (2B, TD)
    td = zi.shape[1]

    # Process output rows in chunks to bound vreg pressure.
    vec = jnp.zeros((1, td), jnp.float32)
    for r0 in range(0, td, row_chunk):
        zic = zi[:, r0:r0 + row_chunk]                               # (2B, rc)
        m = lax.dot_general(zic, zsj, (((0,), (0,)), ((), ())),
                            preferred_element_type=jnp.float32)      # (rc, TD)
        vec = vec + jnp.sum(m * m, axis=0, keepdims=True)            # (1, TD)

    partial = (w * scale) * jnp.sum(vec)
    out_ref[...] = jnp.zeros((1, 8, 128), jnp.float32) + partial


def _coral_loss_tiled(z, zs, d_orig, b, *, block_d):
    two_b, d_pad = z.shape
    nd = d_pad // block_d
    iu, ju = np.triu_indices(nd)                     # i <= j block pairs
    ii = jnp.asarray(iu, dtype=jnp.int32)
    jj = jnp.asarray(ju, dtype=jnp.int32)
    num_pairs = int(iu.shape[0])
    scale = 1.0 / (float(b - 1) ** 2 * 4.0 * float(d_orig) ** 2)
    row_chunk = min(128, block_d)

    kernel = functools.partial(_coral_tiled_kernel, scale=scale,
                               row_chunk=row_chunk)
    partials = pl.pallas_call(
        kernel,
        out_shape=jax.ShapeDtypeStruct((num_pairs, 8, 128), jnp.float32),
        grid_spec=pltpu.PrefetchScalarGridSpec(
            num_scalar_prefetch=2,
            grid=(num_pairs,),
            in_specs=[
                pl.BlockSpec((two_b, block_d),
                             lambda p, ii_r, jj_r: (0, ii_r[p])),
                pl.BlockSpec((two_b, block_d),
                             lambda p, ii_r, jj_r: (0, jj_r[p])),
            ],
            out_specs=pl.BlockSpec((1, 8, 128),
                                   lambda p, ii_r, jj_r: (p, 0, 0)),
        ),
        compiler_params=pltpu.CompilerParams(
            dimension_semantics=("parallel",)),   # independent pair steps
    )(ii, jj, z, zs)
    return jnp.sum(partials[:, 0, 0])


# ---------------------------------------------------------------------------
# Public wrapper (matches the PyTorch CORALLoss forward).
# ---------------------------------------------------------------------------
def coral_loss(x, y, *, block_d=256, gram_block_k=2048, force_path=None):
    """CORAL loss between NCHW feature tensors x and y."""
    assert x.shape == y.shape
    assert block_d % 128 == 0 and gram_block_k % 128 == 0
    b = x.shape[0]
    if b < 2:
        raise ValueError("CORAL loss requires batch size >= 2 (uses 1/(b-1)).")

    # 'b c h w -> b (c h w)'  (metadata-only reshape)
    xf = x.reshape(b, -1)
    yf = y.reshape(b, -1)
    d = xf.shape[1]

    if force_path is None:
        use_gram = (8 * b < d) and (b <= 1024)
    else:
        use_gram = (force_path == "gram")

    if use_gram:
        # Cap block width so 2 inputs x 2 pipeline buffers stay well under VMEM.
        max_cols = max(128, (((2 * 1024 * 1024) // (4 * b)) // 128) * 128)
        block_k = min(gram_block_k, _round_up(d, 128), max_cols)
        d_pad = _round_up(d, block_k)
        pad = d_pad - d
        if pad:
            # Zero-padded columns have zero mean -> centered to zero -> exact.
            xf = jnp.pad(xf, ((0, 0), (0, pad)))
            yf = jnp.pad(yf, ((0, 0), (0, pad)))
        return _coral_loss_gram(xf, yf, d, b, block_k=block_k)

    # Generic tiled path: center once in the wrapper, build signed stacks.
    compute_dtype = jnp.bfloat16 if x.dtype == jnp.bfloat16 else jnp.float32
    xf32 = xf.astype(jnp.float32)
    yf32 = yf.astype(jnp.float32)
    xc = (xf32 - jnp.mean(xf32, axis=0, keepdims=True)).astype(compute_dtype)
    yc = (yf32 - jnp.mean(yf32, axis=0, keepdims=True)).astype(compute_dtype)

    block = min(block_d, _round_up(d, 128))
    d_pad = _round_up(d, block)
    pad = d_pad - d
    if pad:
        # Zero-padding *centered* features is exact (contributes nothing).
        xc = jnp.pad(xc, ((0, 0), (0, pad)))
        yc = jnp.pad(yc, ((0, 0), (0, pad)))
    z = jnp.concatenate([xc, yc], axis=0)                # (2B, Dp)
    zs = jnp.concatenate([xc, -yc], axis=0)              # (2B, Dp), signed
    return _coral_loss_tiled(z, zs, d, b, block_d=block)


def coral_loss_ref(x, y):
    """Pure-JAX reference matching the PyTorch module exactly."""
    b = x.shape[0]
    xf = x.reshape(b, -1).astype(jnp.float32)
    yf = y.reshape(b, -1).astype(jnp.float32)
    d = xf.shape[1]

    def cov(a):
        mm1 = a.T @ a
        s = a.sum(axis=0)
        mm2 = jnp.outer(s, s)
        return 1.0 / (b - 1) * (mm1 - 1.0 / b * mm2)

    diff = cov(xf) - cov(yf)
    return jnp.sum(diff * diff) / (4 * d ** 2)


if __name__ == "__main__":
    key = jax.random.PRNGKey(0)
    kx, ky = jax.random.split(key)
    # NCHW features from the two domains: batch=2, channels=4, spatial=16x16.
    x = jax.random.normal(kx, (2, 4, 16, 16), dtype=jnp.float32)
    y = jax.random.normal(ky, (2, 4, 16, 16), dtype=jnp.float32)

    ref = jax.block_until_ready(coral_loss_ref(x, y))

    # Default dispatch (B << D -> fused centering + Gram-trace fast path).
    loss_fast = jax.block_until_ready(coral_loss(x, y))
    assert jnp.allclose(loss_fast, ref, rtol=1e-3, atol=1e-5), (loss_fast, ref)

    # Also exercise the generic tiled (D x D block) kernel.
    loss_tiled = jax.block_until_ready(coral_loss(x, y, force_path="tiled"))
    assert jnp.allclose(loss_tiled, ref, rtol=1e-3, atol=1e-5), (loss_tiled, ref)

    print("KERNEL_OK")
</pallas_src>

<mosaic_0001>
module attributes {stable_mosaic.version = 11 : i64} {
  func.func @_coral_gram_kernel(%arg0: i32, %arg1: memref<2x1024xf32, #tpu.memory_space<vmem>>, %arg2: memref<2x1024xf32, #tpu.memory_space<vmem>>, %arg3: memref<8x128xf32, #tpu.memory_space<vmem>>, %arg4: memref<2x2xf32, #tpu.memory_space<vmem>>, %arg5: memref<2x2xf32, #tpu.memory_space<vmem>>, %arg6: memref<2x2xf32, #tpu.memory_space<vmem>>) attributes {dimension_semantics = [#tpu.dimension_semantics<arbitrary>], iteration_bounds = array<i64: 1>, scalar_prefetch = 0 : i64, scratch_operands = 3 : i64, tpu.core_type = #tpu.core_type<tc>, window_params = [{transform_indices = @transform_0, window_bounds = array<i64: 2, 1024>}, {transform_indices = @transform_1, window_bounds = array<i64: 2, 1024>}, {pipeline_mode = #tpu.pipeline_mode<synchronous>, transform_indices = @transform_2, window_bounds = array<i64: 8, 128>}]} {
    %c0_i32 = arith.constant 0 : i32
    %0 = arith.cmpi eq, %arg0, %c0_i32 : i32
    %1 = arith.extui %0 : i1 to i32
    %c0_i32_0 = arith.constant 0 : i32
    %2 = arith.cmpi ne, %1, %c0_i32_0 : i32
    scf.if %2 {
      %cst_24 = arith.constant 0.000000e+00 : f32
      %32 = vector.broadcast %cst_24 : f32 to vector<2x2xf32>
      %c0_25 = arith.constant 0 : index
      %c0_26 = arith.constant 0 : index
      %33 = vector.load %arg4[%c0_25, %c0_26] : memref<2x2xf32, #tpu.memory_space<vmem>>, vector<2x2xf32>
      tpu.vector_store %arg4[%c0_25, %c0_26], %32 {strides = array<i32>} : memref<2x2xf32, #tpu.memory_space<vmem>>, vector<2x2xf32>,
      %cst_27 = arith.constant 0.000000e+00 : f32
      %34 = vector.broadcast %cst_27 : f32 to vector<2x2xf32>
      %c0_28 = arith.constant 0 : index
      %c0_29 = arith.constant 0 : index
      %35 = vector.load %arg5[%c0_28, %c0_29] : memref<2x2xf32, #tpu.memory_space<vmem>>, vector<2x2xf32>
      tpu.vector_store %arg5[%c0_28, %c0_29], %34 {strides = array<i32>} : memref<2x2xf32, #tpu.memory_space<vmem>>, vector<2x2xf32>,
      %cst_30 = arith.constant 0.000000e+00 : f32
      %36 = vector.broadcast %cst_30 : f32 to vector<2x2xf32>
      %c0_31 = arith.constant 0 : index
      %c0_32 = arith.constant 0 : index
      %37 = vector.load %arg6[%c0_31, %c0_32] : memref<2x2xf32, #tpu.memory_space<vmem>>, vector<2x2xf32>
      tpu.vector_store %arg6[%c0_31, %c0_32], %36 {strides = array<i32>} : memref<2x2xf32, #tpu.memory_space<vmem>>, vector<2x2xf32>,
      %cst_33 = arith.constant 0.000000e+00 : f32
      %38 = vector.broadcast %cst_33 : f32 to vector<8x128xf32>
      %c0_34 = arith.constant 0 : index
      %c0_35 = arith.constant 0 : index
      %39 = vector.load %arg3[%c0_34, %c0_35] : memref<8x128xf32, #tpu.memory_space<vmem>>, vector<8x128xf32>
      tpu.vector_store %arg3[%c0_34, %c0_35], %38 {strides = array<i32>} : memref<8x128xf32, #tpu.memory_space<vmem>>, vector<8x128xf32>,
    } else {
    }
    %c0 = arith.constant 0 : index
    %c0_1 = arith.constant 0 : index
    %3 = vector.load %arg1[%c0, %c0_1] : memref<2x1024xf32, #tpu.memory_space<vmem>>, vector<2x1024xf32>
    %c0_2 = arith.constant 0 : index
    %c0_3 = arith.constant 0 : index
    %4 = vector.load %arg2[%c0_2, %c0_3] : memref<2x1024xf32, #tpu.memory_space<vmem>>, vector<2x1024xf32>
    %cst = arith.constant dense<0.000000e+00> : vector<1024xf32>
    %5 = vector.multi_reduction <add>, %3, %cst [0] : vector<2x1024xf32> to vector<1024xf32>
    %6 = vector.shape_cast %5 : vector<1024xf32> to vector<1x1024xf32>
    %cst_4 = arith.constant 2.000000e+00 : f32
    %7 = vector.broadcast %cst_4 : f32 to vector<1x1024xf32>
    %8 = arith.divf %6, %7 : vector<1x1024xf32>
    %9 = vector.broadcast %8 : vector<1x1024xf32> to vector<2x1024xf32>
    %10 = arith.subf %3, %9 : vector<2x1024xf32>
    %cst_5 = arith.constant dense<0.000000e+00> : vector<1024xf32>
    %11 = vector.multi_reduction <add>, %4, %cst_5 [0] : vector<2x1024xf32> to vector<1024xf32>
    %12 = vector.shape_cast %11 : vector<1024xf32> to vector<1x1024xf32>
    %cst_6 = arith.constant 2.000000e+00 : f32
    %13 = vector.broadcast %cst_6 : f32 to vector<1x1024xf32>
    %14 = arith.divf %12, %13 : vector<1x1024xf32>
    %15 = vector.broadcast %14 : vector<1x1024xf32> to vector<2x1024xf32>
    %16 = arith.subf %4, %15 : vector<2x1024xf32>
    %c0_7 = arith.constant 0 : index
    %c0_8 = arith.constant 0 : index
    %17 = vector.load %arg4[%c0_7, %c0_8] : memref<2x2xf32, #tpu.memory_space<vmem>>, vector<2x2xf32>
    %cst_9 = arith.constant dense<0.000000e+00> : vector<2x2xf32>
    %18 = tpu.matmul %10, %10, %cst_9 {dimension_numbers = #tpu.dot_dimension_numbers<[1], [1], [0], [0], [0, 0, 1, 0], [], []>} : vector<2x1024xf32>, vector<2x1024xf32>, vector<2x2xf32> -> vector<2x2xf32>
    %19 = arith.addf %17, %18 : vector<2x2xf32>
    %c0_10 = arith.constant 0 : index
    %c0_11 = arith.constant 0 : index
    %20 = vector.load %arg4[%c0_10, %c0_11] : memref<2x2xf32, #tpu.memory_space<vmem>>, vector<2x2xf32>
    tpu.vector_store %arg4[%c0_10, %c0_11], %19 {strides = array<i32>} : memref<2x2xf32, #tpu.memory_space<vmem>>, vector<2x2xf32>,
    %c0_12 = arith.constant 0 : index
    %c0_13 = arith.constant 0 : index
    %21 = vector.load %arg5[%c0_12, %c0_13] : memref<2x2xf32, #tpu.memory_space<vmem>>, vector<2x2xf32>
    %cst_14 = arith.constant dense<0.000000e+00> : vector<2x2xf32>
    %22 = tpu.matmul %10, %16, %cst_14 {dimension_numbers = #tpu.dot_dimension_numbers<[1], [1], [0], [0], [0, 0, 1, 0], [], []>} : vector<2x1024xf32>, vector<2x1024xf32>, vector<2x2xf32> -> vector<2x2xf32>
    %23 = arith.addf %21, %22 : vector<2x2xf32>
    %c0_15 = arith.constant 0 : index
    %c0_16 = arith.constant 0 : index
    %24 = vector.load %arg5[%c0_15, %c0_16] : memref<2x2xf32, #tpu.memory_space<vmem>>, vector<2x2xf32>
    tpu.vector_store %arg5[%c0_15, %c0_16], %23 {strides = array<i32>} : memref<2x2xf32, #tpu.memory_space<vmem>>, vector<2x2xf32>,
    %c0_17 = arith.constant 0 : index
    %c0_18 = arith.constant 0 : index
    %25 = vector.load %arg6[%c0_17, %c0_18] : memref<2x2xf32, #tpu.memory_space<vmem>>, vector<2x2xf32>
    %cst_19 = arith.constant dense<0.000000e+00> : vector<2x2xf32>
    %26 = tpu.matmul %16, %16, %cst_19 {dimension_numbers = #tpu.dot_dimension_numbers<[1], [1], [0], [0], [0, 0, 1, 0], [], []>} : vector<2x1024xf32>, vector<2x1024xf32>, vector<2x2xf32> -> vector<2x2xf32>
    %27 = arith.addf %25, %26 : vector<2x2xf32>
    %c0_20 = arith.constant 0 : index
    %c0_21 = arith.constant 0 : index
    %28 = vector.load %arg6[%c0_20, %c0_21] : memref<2x2xf32, #tpu.memory_space<vmem>>, vector<2x2xf32>
    tpu.vector_store %arg6[%c0_20, %c0_21], %27 {strides = array<i32>} : memref<2x2xf32, #tpu.memory_space<vmem>>, vector<2x2xf32>,
    %c0_i32_22 = arith.constant 0 : i32
    %29 = arith.cmpi eq, %arg0, %c0_i32_22 : i32
    %30 = arith.extui %29 : i1 to i32
    %c0_i32_23 = arith.constant 0 : i32
    %31 = arith.cmpi ne, %30, %c0_i32_23 : i32
    scf.if %31 {
      %c0_24 = arith.constant 0 : index
      %c0_25 = arith.constant 0 : index
      %32 = vector.load %arg4[%c0_24, %c0_25] : memref<2x2xf32, #tpu.memory_space<vmem>>, vector<2x2xf32>
      %c0_26 = arith.constant 0 : index
      %c0_27 = arith.constant 0 : index
      %33 = vector.load %arg4[%c0_26, %c0_27] : memref<2x2xf32, #tpu.memory_space<vmem>>, vector<2x2xf32>
      %34 = arith.mulf %32, %33 : vector<2x2xf32>
      %35 = vector.shape_cast %34 : vector<2x2xf32> to vector<1x2x2xf32>
      %cst_28 = arith.constant dense<0.000000e+00> : vector<1xf32>
      %36 = vector.multi_reduction <add>, %35, %cst_28 [1, 2] : vector<1x2x2xf32> to vector<1xf32>
      %37 = vector.shape_cast %36 : vector<1xf32> to vector<1x1x1xf32>
      %38 = vector.extract %37[0, 0, 0] : f32 from vector<1x1x1xf32>
      %c0_29 = arith.constant 0 : index
      %c0_30 = arith.constant 0 : index
      %39 = vector.load %arg5[%c0_29, %c0_30] : memref<2x2xf32, #tpu.memory_space<vmem>>, vector<2x2xf32>
      %c0_31 = arith.constant 0 : index
      %c0_32 = arith.constant 0 : index
      %40 = vector.load %arg5[%c0_31, %c0_32] : memref<2x2xf32, #tpu.memory_space<vmem>>, vector<2x2xf32>
      %41 = arith.mulf %39, %40 : vector<2x2xf32>
      %42 = vector.shape_cast %41 : vector<2x2xf32> to vector<1x2x2xf32>
      %cst_33 = arith.constant dense<0.000000e+00> : vector<1xf32>
      %43 = vector.multi_reduction <add>, %42, %cst_33 [1, 2] : vector<1x2x2xf32> to vector<1xf32>
      %44 = vector.shape_cast %43 : vector<1xf32> to vector<1x1x1xf32>
      %45 = vector.extract %44[0, 0, 0] : f32 from vector<1x1x1xf32>
      %cst_34 = arith.constant 2.000000e+00 : f32
      %46 = arith.mulf %cst_34, %45 : f32
      %47 = arith.subf %38, %46 : f32
      %c0_35 = arith.constant 0 : index
      %c0_36 = arith.constant 0 : index
      %48 = vector.load %arg6[%c0_35, %c0_36] : memref<2x2xf32, #tpu.memory_space<vmem>>, vector<2x2xf32>
      %c0_37 = arith.constant 0 : index
      %c0_38 = arith.constant 0 : index
      %49 = vector.load %arg6[%c0_37, %c0_38] : memref<2x2xf32, #tpu.memory_space<vmem>>, vector<2x2xf32>
      %50 = arith.mulf %48, %49 : vector<2x2xf32>
      %51 = vector.shape_cast %50 : vector<2x2xf32> to vector<1x2x2xf32>
      %cst_39 = arith.constant dense<0.000000e+00> : vector<1xf32>
      %52 = vector.multi_reduction <add>, %51, %cst_39 [1, 2] : vector<1x2x2xf32> to vector<1xf32>
      %53 = vector.shape_cast %52 : vector<1xf32> to vector<1x1x1xf32>
      %54 = vector.extract %53[0, 0, 0] : f32 from vector<1x1x1xf32>
      %55 = arith.addf %47, %54 : f32
      %cst_40 = arith.constant 0.000000e+00 : f32
      %56 = vector.broadcast %cst_40 : f32 to vector<8x128xf32>
      %cst_41 = arith.constant 2.38418579E-7 : f32
      %57 = arith.mulf %55, %cst_41 : f32
      %58 = vector.broadcast %57 : f32 to vector<8x128xf32>
      %59 = arith.addf %56, %58 : vector<8x128xf32>
      %c0_42 = arith.constant 0 : index
      %c0_43 = arith.constant 0 : index
      %60 = vector.load %arg3[%c0_42, %c0_43] : memref<8x128xf32, #tpu.memory_space<vmem>>, vector<8x128xf32>
      tpu.vector_store %arg3[%c0_42, %c0_43], %59 {strides = array<i32>} : memref<8x128xf32, #tpu.memory_space<vmem>>, vector<8x128xf32>,
    } else {
    }
    return
  }
  func.func @transform_0(%arg0: i32) -> (i32, i32) {
    %c0_i32 = arith.constant 0 : i32
    %c0_i32_0 = arith.constant 0 : i32
    return %c0_i32, %arg0 : i32, i32
  }
  func.func @transform_1(%arg0: i32) -> (i32, i32) {
    %c0_i32 = arith.constant 0 : i32
    %c0_i32_0 = arith.constant 0 : i32
    return %c0_i32, %arg0 : i32, i32
  }
  func.func @transform_2(%arg0: i32) -> (i32, i32) {
    %c0_i32 = arith.constant 0 : i32
    %c0_i32_0 = arith.constant 0 : i32
    %c0_i32_1 = arith.constant 0 : i32
    return %c0_i32, %c0_i32_0 : i32, i32
  }
}

</mosaic_0001>

<bundles_post_ra>
// kernel: tpu_custom_call.1
= control target key start
LH: loop header
LB: loop body
LE: loop exit
PB: predicated region body
PF: predicated region fallthrough
CT: control target
= control target key end

     0   :  { %7 = vsyncpa [#allocation6], 0  ;;  %s1633_s0 = inlined_call_operand.hbm [shape: f32[2,1024], index: 0, kind: input, shape index: {}]   ;;  %s1634_s1 = inlined_call_operand.hbm [shape: f32[2,1024], index: 1, kind: input, shape index: {}]   ;;  %s1635_s2 = inlined_call_operand.hbm [shape: f32[8,128], index: 2, kind: output, shape index: {}]  }
   0x1   :  { %8 = vsyncpa [#allocation9], 0 }
   0x2   :  { %9 = vsyncpa [#allocation7], 0  ;;  %s1446_s9 = smov [#allocation5]   ;;  %s1447_s11 = smov [#allocation8]  }
   0x3   :  { %s16_s10 = sshll.u32 %s1446_s9, 4  ;;  %s26_s12 = sshll.u32 %s1447_s11, 4  ;;  %s17_s10 = int_to_ptr.vmem [resolvable:$true] %s16_s10  ;;  %s27_s12 = int_to_ptr.vmem [resolvable:$true] %s26_s12 }
   0x4   :  { %s1374_s15 = scalar_lea.hbm %s1633_s0, 256 }
   0x5   :  { %p1375_p0 = scmp.ne.s32.totalorder %s1633_s0, %s1374_s15  ;;  %p1378_p1 = scmp.lt.u32.totalorder %s1374_s15, %s1633_s0 }
   0x7   :  { %p1380_p2 = pnand %p1378_p1, %p1375_p0 }
   0x9   :  { %1383 = shalt.err (!%p1380_p2)
}
   0xa   :  { %s1384_s20 = scalar_lea.vmem %s17_s10, 256  ;;  %p1389_p4 = scmp.lt.s32.totalorder %s17_s10, %s17_s10 }
   0xb   :  { %p1385_p3 = scmp.ne.s32.totalorder %s17_s10, %s1384_s20  ;;  %p1390_p5 = scmp.lt.s32.totalorder %s1384_s20, %s1384_s20 }
   0xd   :  { %p1391_p6 = por %p1390_p5, %p1389_p4 }
   0xf   :  { %p1392_p7 = pnand %p1391_p6, %p1385_p3 }
  0x11   :  { %1395 = shalt.err (!%p1392_p7)
}
  0x12   :  { %19 = dma.hbm_to_vmem [thread:$0]  %s1633_s0, 256, %s17_s10, [#allocation6]  }
  0x13   :  { %s1396_s25 = scalar_lea.hbm %s1634_s1, 256 }
  0x14   :  { %p1397_p8 = scmp.ne.s32.totalorder %s1634_s1, %s1396_s25  ;;  %p1400_p9 = scmp.lt.u32.totalorder %s1396_s25, %s1634_s1 }
  0x16   :  { %p1402_p10 = pnand %p1400_p9, %p1397_p8 }
  0x18   :  { %1405 = shalt.err (!%p1402_p10)
}
  0x19   :  { %s1406_s30 = scalar_lea.vmem %s27_s12, 256  ;;  %p1411_p12 = scmp.lt.s32.totalorder %s27_s12, %s27_s12 }
  0x1a   :  { %p1407_p11 = scmp.ne.s32.totalorder %s27_s12, %s1406_s30  ;;  %p1412_p13 = scmp.lt.s32.totalorder %s1406_s30, %s1406_s30 }
  0x1c   :  { %p1413_p0 = por %p1412_p13, %p1411_p12 }
  0x1e   :  { %p1414_p1 = pnand %p1413_p0, %p1407_p11 }
  0x20   :  { %1417 = shalt.err (!%p1414_p1)
}
  0x21   :  { %29 = dma.hbm_to_vmem [thread:$0]  %s1634_s1, 256, %s27_s12, [#allocation9]  }
  0x22   :  { %1440 = dma.done.wait [#allocation6], 256  }
  0x23   :  { %1441 = vsyncadd [#allocation6], 4294967040 }
  0x24   :  { %1442 = dma.done.wait [#allocation9], 256  }
  0x25   :  { %1443 = vsyncadd [#allocation9], 4294967040  ;;  %v55_v0 = vlaneseq  ;;  %v1448_v1 = vmov 1983009808   ;;  %v1492_v6 = vld [vmem:[#allocation5] sm:$0xff]  ;;  %vm93_vm0 = vcmask 1041408  }
  0x26   :  { %v53_v2 = vunpack.c.l.s4 %v1448_v1  ;;  %v1494_v7 = vld [vmem:[#allocation5 + $0x8] sm:$0xff]  ;;  %v1496_v8 = vld [vmem:[#allocation8] sm:$0xff]  ;;  %v51_v9 = vcombine.high %v1492_v6, %v1492_v6  ;;  %v1506_v13 = vld [vmem:[#allocation8 + $0x8] sm:$0xff]  ;;  %vm40_vm1 = vcmask 9216   ;;  %s1450_s9 = smov [#allocation10]  }
  0x27   :  { %v56_v3 = vshrl.u32 %v55_v0, 7  ;;  %v68_v11 = vcombine.high %v1494_v7, %v1494_v7  ;;  %v207_v14 = vcombine.high %v1496_v8, %v1496_v8  ;;  %v224_v16 = vcombine.high %v1506_v13, %v1506_v13  ;;  %s1349_s10 = sshll.u32 %s1450_s9, 4  ;;  %s1350_s10 = int_to_ptr.vmem [resolvable:$true] %s1349_s10 }
  0x28   :  { %v54_v4 = vunpack.c.0.s8 %v53_v2  ;;  %s1418_s12 = scalar_lea.vmem %s1350_s10, 128  ;;  %p1423_p3 = scmp.lt.s32.totalorder %s1350_s10, %s1350_s10 }
  0x29   :  { %p1419_p2 = scmp.ne.s32.totalorder %s1350_s10, %s1418_s12  ;;  %p1424_p4 = scmp.lt.s32.totalorder %s1418_s12, %s1418_s12 }
  0x2a   :  { %v1490_v5 = vsub.s32 %v54_v4, %v56_v3 }
  0x2b   :  { %p1425_p5 = por %p1424_p4, %p1423_p3 }
  0x2c   :  { %v58_v10 = vrot.slane %v1492_v6, %v1490_v5  ;;  %v75_v12 = vrot.slane %v1494_v7, %v1490_v5  ;;  %v1512_v15 = vrot.slane %v1496_v8, %v1490_v5  ;;  %v1518_v17 = vrot.slane %v1506_v13, %v1490_v5 }
  0x2d   :  { %v65_v18 = vrot.slane %v51_v9, %v1490_v5  ;;  %v82_v21 = vrot.slane %v68_v11, %v1490_v5  ;;  %v1525_v25 = vrot.slane %v207_v14, %v1490_v5  ;;  %p1426_p6 = pnand %p1425_p5, %p1419_p2 }
  0x2e   :  { %v66_v19 = vcombine.high %v58_v10, %v58_v10  ;;  %v94_v20 = vsel %vm93_vm0, %v58_v10, 0.0  ;;  %v83_v23 = vcombine.high %v75_v12, %v75_v12  ;;  %v122_v24 = vsel %vm93_vm0, %v75_v12, 0.0 }
  0x2f   :  { %v95_v22 = vrot.slane %v94_v20, 4  ;;  %v67_v26 = vcombine.high %v65_v18, %v65_v18  ;;  %v108_v28 = vsel %vm93_vm0, %v65_v18, 0.0  ;;  %v84_v29 = vcombine.high %v82_v21, %v82_v21 }
  0x30   :  { %v101_v27 = vsel %vm93_vm0, %v66_v19, 0.0  ;;  %v109_v32 = vrot.slane %v108_v28, 4  ;;  %v123_v33 = vrot.slane %v122_v24, 4  ;;  %v129_v35 = vsel %vm93_vm0, %v83_v23, 0.0 }
  0x31   :  { %v96_v30 = vadd.f32 %v95_v22, %v94_v20  ;;  %v102_v31 = vrot.slane %v101_v27, 4  ;;  %v115_v34 = vsel %vm93_vm0, %v67_v26, 0.0  ;;  %v136_v36 = vsel %vm93_vm0, %v82_v21, 0.0 }
  0x32   :  { %v143_v37 = vsel %vm93_vm0, %v84_v29, 0.0  ;;  %v110_v40 = vadd.f32 %v109_v32, %v108_v28  ;;  %v116_v41 = vrot.slane %v115_v34, 4  ;;  %v124_v42 = vadd.f32 %v123_v33, %v122_v24 }
  0x33   :  { %v97_v38 = vrot.slane %v96_v30, 2  ;;  %v103_v39 = vadd.f32 %v102_v31, %v101_v27  ;;  %v130_v43 = vrot.slane %v129_v35, 4  ;;  %v137_v44 = vrot.slane %v136_v36, 4 }
  0x34   :  { %v144_v45 = vrot.slane %v143_v37, 4  ;;  %v111_v48 = vrot.slane %v110_v40, 2  ;;  %v117_v49 = vadd.f32 %v116_v41, %v115_v34  ;;  %v125_v50 = vrot.slane %v124_v42, 2 }
  0x35   :  { %v98_v46 = vadd.f32 %v97_v38, %v96_v30  ;;  %v104_v47 = vrot.slane %v103_v39, 2  ;;  %v131_v51 = vadd.f32 %v130_v43, %v129_v35  ;;  %v138_v52 = vadd.f32 %v137_v44, %v136_v36 }
  0x36   :  { %v145_v53 = vadd.f32 %v144_v45, %v143_v37  ;;  %v112_v56 = vadd.f32 %v111_v48, %v110_v40  ;;  %v118_v57 = vrot.slane %v117_v49, 2  ;;  %v126_v58 = vadd.f32 %v125_v50, %v124_v42 }
  0x37   :  { %v99_v54 = vrot.slane %v98_v46, 1  ;;  %v105_v55 = vadd.f32 %v104_v47, %v103_v39  ;;  %v132_v59 = vrot.slane %v131_v51, 2  ;;  %v139_v60 = vrot.slane %v138_v52, 2 }
  0x38   :  { %v146_v61 = vrot.slane %v145_v53, 2  ;;  %v113_v0 = vrot.slane %v112_v56, 1  ;;  %v119_v1 = vadd.f32 %v118_v57, %v117_v49  ;;  %v127_v2 = vrot.slane %v126_v58, 1 }
  0x39   :  { %v100_v62 = vadd.f32 %v99_v54, %v98_v46  ;;  %v106_v63 = vrot.slane %v105_v55, 1  ;;  %v133_v3 = vadd.f32 %v132_v59, %v131_v51  ;;  %v140_v4 = vadd.f32 %v139_v60, %v138_v52 }
  0x3a   :  { %v147_v9 = vadd.f32 %v146_v61, %v145_v53  ;;  %v114_v11 = vadd.f32 %v113_v0, %v112_v56  ;;  %v120_v12 = vrot.slane %v119_v1, 1  ;;  %v128_v18 = vadd.f32 %v127_v2, %v126_v58 }
  0x3b   :  { %v107_v10 = vadd.f32 %v106_v63, %v105_v55  ;;  %v151_v14 = vmul.f32 0.5, %v100_v62  ;;  %v134_v19 = vrot.slane %v133_v3, 1  ;;  %v141_v20 = vrot.slane %v140_v4, 1 }
  0x3c   :  { %v148_v21 = vrot.slane %v147_v9, 1  ;;  %v121_v22 = vadd.f32 %v120_v12, %v119_v1  ;;  %v153_v24 = vmul.f32 0.5, %v114_v11  ;;  %v222_v26 = vcombine.high %v1512_v15, %v1512_v15 }
  0x3d   :  { %v152_v23 = vmul.f32 0.5, %v107_v10  ;;  %v135_v27 = vadd.f32 %v134_v19, %v133_v3  ;;  %v142_v28 = vadd.f32 %v141_v20, %v140_v4  ;;  %v155_v30 = vmul.f32 0.5, %v128_v18 }
  0x3e   :  { %v149_v29 = vadd.f32 %v148_v21, %v147_v9  ;;  %v154_v31 = vmul.f32 0.5, %v121_v22  ;;  %v223_v33 = vcombine.high %v1525_v25, %v1525_v25  ;;  %v249_v34 = vsel %vm93_vm0, %v1512_v15, 0.0 }
  0x3f   :  { %v167_v32 = vcombine.low %v151_v14, %v152_v23  ;;  %v156_v35 = vmul.f32 0.5, %v135_v27  ;;  %v157_v36 = vmul.f32 0.5, %v142_v28  ;;  %v250_v38 = vrot.slane %v249_v34, 4 }
  0x40   :  { %v158_v37 = vmul.f32 0.5, %v149_v29  ;;  %v168_v39 = vcombine.low %v153_v24, %v154_v31  ;;  %v256_v41 = vsel %vm93_vm0, %v222_v26, 0.0  ;;  %v263_v42 = vsel %vm93_vm0, %v1525_v25, 0.0 }
  0x41   :  { %v175_v40 = vrot.slane %v167_v32, %v1490_v5  ;;  %v184_v43 = vcombine.low %v155_v30, %v156_v35  ;;  %v251_v45 = vadd.f32 %v250_v38, %v249_v34  ;;  %v257_v46 = vrot.slane %v256_v41, 4 }
  0x42   :  { %v185_v44 = vcombine.low %v157_v36, %v158_v37  ;;  %v182_v47 = vrot.slane %v168_v39, %v1490_v5  ;;  %v264_v48 = vrot.slane %v263_v42, 4  ;;  %v270_v15 = vsel %vm93_vm0, %v223_v33, 0.0 }
  0x43   :  { %v238_v49 = vrot.slane %v224_v16, %v1490_v5  ;;  %v192_v50 = vrot.slane %v184_v43, %v1490_v5  ;;  %v252_v52 = vrot.slane %v251_v45, 2  ;;  %v258_v25 = vadd.f32 %v257_v46, %v256_v41 }
  0x44   :  { %v199_v51 = vrot.slane %v185_v44, %v1490_v5  ;;  %v183_v53 = vcombine.low %v175_v40, %v182_v47  ;;  %v265_v54 = vadd.f32 %v264_v48, %v263_v42  ;;  %v271_v55 = vrot.slane %v270_v15, 4 }
  0x45   :  { %v239_v56 = vcombine.high %v1518_v17, %v1518_v17  ;;  %v253_v58 = vadd.f32 %v252_v52, %v251_v45  ;;  %v259_v59 = vrot.slane %v258_v25, 2  ;;  %v240_v60 = vcombine.high %v238_v49, %v238_v49 }
  0x46   :  { %v200_v57 = vcombine.low %v192_v50, %v199_v51  ;;  %v203_v61 = vsub.f32 %v1492_v6, %v183_v53  ;;  %v266_v62 = vrot.slane %v265_v54, 2  ;;  %v272_v16 = vadd.f32 %v271_v55, %v270_v15 }
  0x47   :  { %v277_v63 = vsel %vm93_vm0, %v1518_v17, 0.0  ;;  %v254_v1 = vrot.slane %v253_v58, 1  ;;  %v260_v2 = vadd.f32 %v259_v59, %v258_v25  ;;  %v284_v32 = vsel %vm93_vm0, %v239_v56, 0.0 }
  0x48   :  { %v204_v0 = vsub.f32 %v1494_v7, %v200_v57  ;;  %v278_v3 = vrot.slane %v277_v63, 4  ;;  %v1558_v4 = vrot.slane %v203_v61, %v1490_v5  ;;  %v362_v9 = vcombine.high %v203_v61, %v203_v61 }
  0x49   :  { %v267_v10 = vadd.f32 %v266_v62, %v265_v54  ;;  %v273_v11 = vrot.slane %v272_v16, 2  ;;  %v255_v14 = vadd.f32 %v254_v1, %v253_v58  ;;  %v261_v18 = vrot.slane %v260_v2, 1 }
  0x4a   :  { %v1561_v12 = vrot.slane %v204_v0, %v1490_v5  ;;  %v379_v6 = vcombine.high %v204_v0, %v204_v0  ;;  %v377_v17 = vcombine.high %v1558_v4, %v1558_v4  ;;  %v1566_v7 = vrot.slane %v362_v9, %v1490_v5 }
  0x4b   :  { %v268_v19 = vrot.slane %v267_v10, 1  ;;  %v274_v20 = vadd.f32 %v273_v11, %v272_v16  ;;  %v262_v23 = vadd.f32 %v261_v18, %v260_v2  ;;  %v305_v24 = vmul.f32 0.5, %v255_v14 }
  0x4c   :  { %v1570_v21 = vcombine.high %v1561_v12, %v1561_v12  ;;  %v1573_v22 = vrot.slane %v379_v6, %v1490_v5  ;;  %404 = vmatprep.subr.mxu0 %v377_v17  ;;  %v378_v26 = vcombine.high %v1566_v7, %v1566_v7  ;;  %468 = vmatprep.mubr.f32.mxu0 %v377_v17  ;;  %v291_v33 = vsel %vm93_vm0, %v238_v49, 0.0 }
  0x4d   :  { %v269_v27 = vadd.f32 %v268_v19, %v267_v10  ;;  %v275_v28 = vrot.slane %v274_v20, 1  ;;  %v279_v29 = vadd.f32 %v278_v3, %v277_v63  ;;  %405 = vmatpush1.xpose.msra.mxu0 %v1558_v4  ;;  %v306_v31 = vmul.f32 0.5, %v262_v23 }
  0x4e   :  { %v1580_v30 = vcombine.high %v1573_v22, %v1573_v22  ;;  %474 = vmatprep.subr.mxu1 %v378_v26  ;;  %544 = vmatprep.subr.mxu0 %v1570_v21  ;;  %v285_v37 = vrot.slane %v284_v32, 4  ;;  %v292_v39 = vrot.slane %v291_v33, 4  ;;  %v298_v40 = vsel %vm93_vm0, %v240_v60, 0.0 }
  0x4f   :  { %v276_v34 = vadd.f32 %v275_v28, %v274_v20  ;;  %v307_v35 = vmul.f32 0.5, %v269_v27  ;;  %v280_v36 = vrot.slane %v279_v29, 2  ;;  %475 = vmatpush1.xpose.msra.mxu1 %v1566_v7  ;;  %538 = vmatprep.mubr.f32.mxu1 %v378_v26  ;;  %v321_v38 = vcombine.low %v305_v24, %v306_v31 }
  0x50   :  { %469 = vmatmul.mubr.f32.vlgmr.msra.gmra.mrb[0].mxu0 %v1558_v4  ;;  %614 = vmatprep.subr.mxu1 %v1580_v30  ;;  %v286_v43 = vadd.f32 %v285_v37, %v284_v32  ;;  %v299_v44 = vrot.slane %v298_v40, 4  ;;  %v293_v46 = vadd.f32 %v292_v39, %v291_v33 }
  0x51   :  { %v308_v41 = vmul.f32 0.5, %v276_v34  ;;  %v281_v42 = vadd.f32 %v280_v36, %v279_v29  ;;  %545 = vmatpush1.xpose.msra.mxu0 %v1561_v12  ;;  %608 = vmatprep.mubr.f32.mxu0 %v1570_v21  ;;  %v329_v45 = vrot.slane %v321_v38, %v1490_v5 }
  0x52   :  { %539 = vmatmul.mubr.f32.vlgmr.msra.gmra.mrb[0].mxu1 %v1566_v7  ;;  %v287_v15 = vrot.slane %v286_v43, 2  ;;  %v300_v49 = vadd.f32 %v299_v44, %v298_v40  ;;  %v294_v50 = vrot.slane %v293_v46, 2 }
  0x53   :  { %v322_v47 = vcombine.low %v307_v35, %v308_v41  ;;  %v282_v48 = vrot.slane %v281_v42, 1  ;;  %615 = vmatpush1.xpose.msra.mxu1 %v1573_v22  ;;  %678 = vmatprep.mubr.f32.mxu1 %v1580_v30 }
  0x54   :  { %609 = vmatmul.mubr.f32.vlgmr.msra.gmra.mrb[2].mxu0 %v1561_v12  ;;  %v288_v25 = vadd.f32 %v287_v15, %v286_v43  ;;  %v301_v53 = vrot.slane %v300_v49, 2  ;;  %v295_v54 = vadd.f32 %v294_v50, %v293_v46 }
  0x55   :  { %v336_v51 = vrot.slane %v322_v47, %v1490_v5  ;;  %v283_v52 = vadd.f32 %v282_v48, %v281_v42  ;;  %796 = vmatprep.mubr.f32.mxu0 %v377_v17 }
  0x56   :  { %679 = vmatmul.mubr.f32.vlgmr.msra.gmra.mrb[2].mxu1 %v1573_v22  ;;  %v289_v56 = vrot.slane %v288_v25, 1  ;;  %v302_v57 = vadd.f32 %v301_v53, %v300_v49  ;;  %v296_v58 = vrot.slane %v295_v54, 1 }
  0x57   :  { %v337_v55 = vcombine.low %v329_v45, %v336_v51  ;;  %866 = vmatprep.mubr.f32.mxu1 %v378_v26  ;;  %v309_v62 = vmul.f32 0.5, %v283_v52 }
  0x58   :  { %v290_v60 = vadd.f32 %v289_v56, %v288_v25  ;;  %v303_v61 = vrot.slane %v302_v57, 1  ;;  %v297_v16 = vadd.f32 %v296_v58, %v295_v54 }
  0x59   :  { %v357_v59 = vsub.f32 %v1496_v8, %v337_v55 }
  0x5a   :  { %v304_v1 = vadd.f32 %v303_v61, %v302_v57  ;;  %v310_v2 = vmul.f32 0.5, %v290_v60  ;;  %v311_v3 = vmul.f32 0.5, %v297_v16 }
  0x5b   :  { %v697_v63 = vrot.slane %v357_v59, %v1490_v5  ;;  %v690_v0 = vcombine.high %v357_v59, %v357_v59 }
  0x5c   :  { %v312_v11 = vmul.f32 0.5, %v304_v1  ;;  %v338_v6 = vcombine.low %v309_v62, %v310_v2 }
  0x5d   :  { %v705_v9 = vcombine.high %v697_v63, %v697_v63  ;;  %v704_v10 = vrot.slane %v690_v0, %v1490_v5 }
  0x5e   :  { %v339_v18 = vcombine.low %v311_v3, %v312_v11  ;;  %v346_v8 = vrot.slane %v338_v6, %v1490_v5 }
  0x5f   :  { %732 = vmatprep.subr.mxu0 %v705_v9  ;;  %v706_v14 = vcombine.high %v704_v10, %v704_v10 }
  0x60   :  { %733 = vmatpush1.xpose.msra.mxu0 %v697_v63  ;;  %v353_v17 = vrot.slane %v339_v18, %v1490_v5 }
  0x61   :  { %802 = vmatprep.subr.mxu1 %v706_v14 }
  0x62   :  { %803 = vmatpush1.xpose.msra.mxu1 %v704_v10  ;;  %v354_v19 = vcombine.low %v346_v8, %v353_v17 }
  0x63   :  { %797 = vmatmul.mubr.f32.vlgmr.msra.gmra.mrb[4].mxu0 %v1558_v4 }
  0x64   :  { %936 = vmatprep.mubr.f32.mxu0 %v1570_v21  ;;  %v358_v20 = vsub.f32 %v1506_v13, %v354_v19 }
  0x65   :  { %867 = vmatmul.mubr.f32.vlgmr.msra.gmra.mrb[4].mxu1 %v1566_v7 }
  0x66   :  { %1006 = vmatprep.mubr.f32.mxu1 %v1580_v30  ;;  %v714_v23 = vrot.slane %v358_v20, %v1490_v5  ;;  %v707_v24 = vcombine.high %v358_v20, %v358_v20 }
  0x68   :  { %v722_v26 = vcombine.high %v714_v23, %v714_v23  ;;  %v721_v27 = vrot.slane %v707_v24, %v1490_v5  ;;  %v1449_v5 = vmov 0.0  }
  0x69   :  { %41 = vst.msk [vmem:[#allocation2] sm:$0x3] %vm40_vm1, %v1449_v5  ;;  %42 = vst.msk [vmem:[#allocation3] sm:$0x3] %vm40_vm1, %v1449_v5 }
  0x6a   :  { %872 = vmatprep.subr.mxu0 %v722_v26  ;;  %v723_v28 = vcombine.high %v721_v27, %v721_v27  ;;  %43 = vst.msk [vmem:[#allocation4] sm:$0x3] %vm40_vm1, %v1449_v5 }
  0x6b   :  { %873 = vmatpush1.xpose.msra.mxu0 %v714_v23 }
  0x6c   :  { %942 = vmatprep.subr.mxu1 %v723_v28  ;;  %1015 = vmatprep.subr.mxu0 %v705_v9 }
  0x6d   :  { %943 = vmatpush1.xpose.msra.mxu1 %v721_v27 }
  0x6e   :  { %937 = vmatmul.mubr.f32.vlgmr.msra.gmra.mrb[6].mxu0 %v1561_v12  ;;  %1085 = vmatprep.subr.mxu1 %v706_v14 }
  0x6f   :  { %1016 = vmatpush1.xpose.msra.mxu0 %v697_v63  ;;  %1079 = vmatprep.mubr.f32.mxu0 %v705_v9 }
  0x70   :  { %1007 = vmatmul.mubr.f32.vlgmr.msra.gmra.mrb[6].mxu1 %v1573_v22  ;;  %1155 = vmatprep.subr.mxu0 %v722_v26  ;;  %v359_v31 = vld [vmem:[#allocation2] sm:$0x3]  ;;  %v687_v47 = vld [vmem:[#allocation3] sm:$0x3] }
  0x71   :  { %1086 = vmatpush1.xpose.msra.mxu1 %v704_v10  ;;  %1149 = vmatprep.mubr.f32.mxu1 %v706_v14  ;;  %v1014_v58 = vld [vmem:[#allocation4] sm:$0x3] }
  0x72   :  { %1080 = vmatmul.mubr.f32.vlgmr.msra.gmra.mrb[8].mxu0 %v697_v63  ;;  %1225 = vmatprep.subr.mxu1 %v723_v28 }
  0x73   :  { %1156 = vmatpush1.xpose.msra.mxu0 %v714_v23  ;;  %1219 = vmatprep.mubr.f32.mxu0 %v722_v26 }
  0x74   :  { %1150 = vmatmul.mubr.f32.vlgmr.msra.gmra.mrb[8].mxu1 %v704_v10 }
  0x75   :  { %1226 = vmatpush1.xpose.msra.mxu1 %v721_v27  ;;  %1289 = vmatprep.mubr.f32.mxu1 %v723_v28 }
  0x76   :  { %1220 = vmatmul.mubr.f32.vlgmr.msra.gmra.mrb[10].mxu0 %v714_v23 }
  0x78   :  { %1290 = vmatmul.mubr.f32.vlgmr.msra.gmra.mrb[10].mxu1 %v721_v27 }
 0x123   :  { %v470_v13 = vpop.f32.mrb[0].mxu0 }
 0x124   :  { %v472_v4 = vpop.f32.mrb[1].mxu0 }
 0x125   :  { %v540_v12 = vpop.f32.mrb[0].mxu1 }
 0x126   :  { %v541_v7 = vadd.f32 %v540_v12, %v470_v13  ;;  %v542_v21 = vpop.f32.mrb[1].mxu1 }
 0x127   :  { %v610_v22 = vpop.f32.mrb[2].mxu0 }
 0x128   :  { %v611_v29 = vadd.f32 %v610_v22, %v541_v7  ;;  %v612_v30 = vpop.f32.mrb[3].mxu0 }
 0x129   :  { %v680_v32 = vpop.f32.mrb[2].mxu1 }
 0x12a   :  { %v681_v33 = vadd.f32 %v680_v32, %v611_v29  ;;  %v682_v34 = vpop.f32.mrb[3].mxu1 }
 0x12c   :  { %v684_v35 = vadd.f32 %v681_v33, %v359_v31 }
 0x12e   :  { %686 = vst.msk [vmem:[#allocation2] sm:$0x3] %vm40_vm1, %v684_v35 }
 0x135   :  { %v1300_v37 = vld [vmem:[#allocation2] sm:$0x3] }
 0x136   :  { %v798_v36 = vpop.f32.mrb[4].mxu0  ;;  %v1301_v39 = vmul.f32 %v1300_v37, %v1300_v37 }
 0x137   :  { %v800_v38 = vpop.f32.mrb[5].mxu0 }
 0x138   :  { %v868_v40 = vpop.f32.mrb[4].mxu1  ;;  %v1302_v43 = vsel %vm40_vm1, %v1301_v39, 0.0 }
 0x139   :  { %v869_v41 = vadd.f32 %v868_v40, %v798_v36  ;;  %v870_v42 = vpop.f32.mrb[5].mxu1  ;;  %1303 = vadd.xlane.f32.xlu0 %v1302_v43 }
 0x141   :  { %v938_v44 = vpop.f32.mrb[6].mxu0 }
 0x142   :  { %v939_v45 = vadd.f32 %v938_v44, %v869_v41  ;;  %v940_v46 = vpop.f32.mrb[7].mxu0 }
 0x143   :  { %v1008_v48 = vpop.f32.mrb[6].mxu1 }
 0x144   :  { %v1009_v15 = vadd.f32 %v1008_v48, %v939_v45  ;;  %v1010_v49 = vpop.f32.mrb[7].mxu1 }
 0x145   :  { %v1081_v50 = vpop.f32.mrb[8].mxu0 }
 0x146   :  { %v1012_v51 = vadd.f32 %v1009_v15, %v687_v47  ;;  %v1083_v52 = vpop.f32.mrb[9].mxu0 }
 0x147   :  { %v1151_v25 = vpop.f32.mrb[8].mxu1 }
 0x148   :  { %1013 = vst.msk [vmem:[#allocation3] sm:$0x3] %vm40_vm1, %v1012_v51  ;;  %v1152_v53 = vadd.f32 %v1151_v25, %v1081_v50  ;;  %v1153_v54 = vpop.f32.mrb[9].mxu1 }
 0x149   :  { %v1221_v55 = vpop.f32.mrb[10].mxu0 }
 0x14a   :  { %v1222_v56 = vadd.f32 %v1221_v55, %v1152_v53  ;;  %v1223_v57 = vpop.f32.mrb[11].mxu0 }
 0x14b   :  { %v1291_v59 = vpop.f32.mrb[10].mxu1 }
 0x14c   :  { %v1292_v60 = vadd.f32 %v1291_v59, %v1222_v56  ;;  %v1293_v61 = vpop.f32.mrb[11].mxu1 }
 0x14e   :  { %v1295_v62 = vadd.f32 %v1292_v60, %v1014_v58 }
 0x14f   :  { %v1312_v16 = vld [vmem:[#allocation3] sm:$0x3] }
 0x150   :  { %1296 = vst.msk [vmem:[#allocation4] sm:$0x3] %vm40_vm1, %v1295_v62  ;;  %v1313_v63 = vmul.f32 %v1312_v16, %v1312_v16 }
 0x152   :  { %v1314_v0 = vsel %vm40_vm1, %v1313_v63, 0.0 }
 0x153   :  { %1315 = vadd.xlane.f32.xlu0 %v1314_v0 }
 0x157   :  { %v1326_v1 = vld [vmem:[#allocation4] sm:$0x3] }
 0x158   :  { %v1327_v2 = vmul.f32 %v1326_v1, %v1326_v1 }
 0x15a   :  { %v1328_v3 = vsel %vm40_vm1, %v1327_v2, 0.0 }
 0x15b   :  { %1329 = vadd.xlane.f32.xlu1 %v1328_v3 }
 0x1c6   :  { %v1304_v9 = vpop.xlane.xlu0 %1303 }
 0x1c7   :  { %v1305_v10 = vrot.slane %v1304_v9, 4 }
 0x1c9   :  { %v1306_v11 = vadd.f32 %v1305_v10, %v1304_v9 }
 0x1cb   :  { %v1307_v6 = vrot.slane %v1306_v11, 2 }
 0x1cd   :  { %v1308_v14 = vadd.f32 %v1307_v6, %v1306_v11 }
 0x1cf   :  { %v1309_v18 = vrot.slane %v1308_v14, 1 }
 0x1d1   :  { %v1310_v8 = vadd.f32 %v1309_v18, %v1308_v14 }
 0x1d3   :  { %1359 = vpush %v1310_v8 }
 0x1e0   :  { %v1316_v17 = vpop.xlane.xlu0 %1315 }
 0x1e1   :  { %v1317_v19 = vrot.slane %v1316_v17, 4 }
 0x1e3   :  { %v1318_v20 = vadd.f32 %v1317_v19, %v1316_v17 }
 0x1e5   :  { %v1319_v23 = vrot.slane %v1318_v20, 2 }
 0x1e7   :  { %v1320_v24 = vadd.f32 %v1319_v23, %v1318_v20 }
 0x1e8   :  { %v1330_v26 = vpop.xlane.xlu1 %1329 }
 0x1e9   :  { %v1331_v27 = vrot.slane %v1330_v26, 4  ;;  %v1321_v28 = vrot.slane %v1320_v24, 1 }
 0x1eb   :  { %v1332_v5 = vadd.f32 %v1331_v27, %v1330_v26  ;;  %v1322_v13 = vadd.f32 %v1321_v28, %v1320_v24 }
 0x1ed   :  { %v1333_v4 = vrot.slane %v1332_v5, 2  ;;  %1361 = vpush %v1322_v13 }
 0x1ef   :  { %v1334_v12 = vadd.f32 %v1333_v4, %v1332_v5 }
 0x1f1   :  { %v1335_v7 = vrot.slane %v1334_v12, 1 }
 0x1f3   :  { %v1336_v21 = vadd.f32 %v1335_v7, %v1334_v12 }
 0x1f5   :  { %1363 = vpush %v1336_v21 }
 0x204   :  { %s1360_s1 = spop %1359 }
 0x21e   :  { %s1362_s4 = spop %1361 }
 0x21f   :  { %s1324_s5 = smul.f32 2.0, %s1362_s4 }
 0x221   :  { %s1325_s6 = ssub.f32 %s1360_s1, %s1324_s5 }
 0x226   :  { %s1364_s7 = spop %1363 }
 0x227   :  { %s1338_s8 = sadd.f32 %s1364_s7, %s1325_s6 }
 0x229   :  { %s1339_s11 = smul.f32 2.3841858e-07, %s1338_s8 }
 0x22b   :  { %v1340_v22 = vstv %s1339_s11 }
 0x22c   :  { %1342 = vst [vmem:[#allocation10] sm:$0xff] %v1340_v22 }
 0x22d   :  { %1429 = shalt.err (!%p1426_p6)
}
 0x22e   :  { %s1430_s15 = scalar_lea.hbm %s1635_s2, 128 }
 0x22f   :  { %p1431_p7 = scmp.ne.s32.totalorder %s1635_s2, %s1430_s15  ;;  %p1434_p8 = scmp.lt.u32.totalorder %s1430_s15, %s1635_s2 }
 0x231   :  { %p1436_p9 = pnand %p1434_p8, %p1431_p7 }
 0x233   :  { %1439 = shalt.err (!%p1436_p9)
}
 0x234   :  { %1352 = dma.vmem_to_hbm [thread:$0]  %s1350_s10, 128, %s1635_s2, [#allocation7]  }
 0x235   :  { %1444 = dma.done.wait [#allocation7], 128  }
 0x236   :  { %1445 = vsyncadd [#allocation7], 4294967168 }
 0x237   :  { %1356 = vsyncpa [#allocation6], 1 }
 0x238   :  { %1357 = vsyncpa [#allocation9], 1 }
 0x239   :  { %1358 = vsyncpa [#allocation7], 1 }

</bundles_post_ra>
